<compile_context>
chip_gen: v7x
topology: tpu7x:2x2x1
jax: 0.10.0
libtpu: 0.0.40
codegen_flags: <defaults>
</compile_context>

<pallas_src>
import jax
import jax.numpy as jnp
from jax.experimental import pallas as pl
from jax.experimental.pallas import tpu as pltpu


# Total padding fused from the three ReplicationPad1d layers.
PAD_LEFT = 2 + 3 + 1   # = 6
PAD_RIGHT = 2 + 4 + 0  # = 6


def _make_pad_kernel(pad_left: int, pad_right: int, w: int):
    """Kernel: body copy + direct sub-range edge stores (no lane-axis concatenate)."""
    def pad_kernel(x_ref, o_ref):
        x = x_ref[...]                                   # (TR, W), loaded once
        rows = x.shape[0]
        # body: the largest (lane-densest) store first
        o_ref[:, pad_left:pad_left + w] = x
        # left replicated edge (broadcast column 0)
        if pad_left > 0:
            o_ref[:, :pad_left] = jnp.broadcast_to(x[:, :1], (rows, pad_left))
        # right replicated edge (broadcast column W-1)
        if pad_right > 0:
            o_ref[:, pad_left + w:] = jnp.broadcast_to(x[:, -1:], (rows, pad_right))
    return pad_kernel


def _pick_row_tile(rows: int, w: int, out_w: int, itemsize: int) -> int:
    """Row tile: multiple of 8 (f32 sublane granularity) or the full row count.

    Sized so the double-buffered input + output blocks stay well under the smallest
    default scoped-VMEM budget across v5e (16 MiB) / v6e (32 MiB) / v7x (32 MiB),
    while staying as large as possible to amortize the ~0.35 us per-grid-step cost.
    """
    if rows <= 8:
        return rows
    budget = 12 * 1024 * 1024          # conservative: fits every generation with headroom
    tr = min(rows, 4096)
    tr -= tr % 8
    while tr > 8 and 2 * tr * (w + out_w) * itemsize > budget:
        tr //= 2
        tr -= tr % 8
    return max(tr, 8)


def fused_replication_pad1d(x, pad_left: int = PAD_LEFT, pad_right: int = PAD_RIGHT):
    """Pallas implementation of the fused triple ReplicationPad1d for (N, C, W) input."""
    orig_shape = x.shape
    w = orig_shape[-1]
    rows = 1
    for d in orig_shape[:-1]:
        rows *= d
    out_w = w + pad_left + pad_right
    itemsize = jnp.dtype(x.dtype).itemsize

    x2d = x.reshape(rows, w)                       # contiguous view: free
    tr = _pick_row_tile(rows, w, out_w, itemsize)
    grid = (pl.cdiv(rows, tr),)

    out2d = pl.pallas_call(
        _make_pad_kernel(pad_left, pad_right, w),
        out_shape=jax.ShapeDtypeStruct((rows, out_w), x.dtype),
        grid=grid,
        in_specs=[pl.BlockSpec((tr, w), lambda i: (i, 0))],
        out_specs=pl.BlockSpec((tr, out_w), lambda i: (i, 0)),
        compiler_params=pltpu.CompilerParams(
            dimension_semantics=("parallel",),     # row tiles are independent (v7x megacore)
        ),
        cost_estimate=pl.CostEstimate(
            flops=0,
            transcendentals=0,
            bytes_accessed=rows * (w + out_w) * itemsize,
        ),
    )(x2d)
    return out2d.reshape(*orig_shape[:-1], out_w)


def model_forward(x):
    # Mirrors Model.forward: pad_0 -> pad_1 -> pad_2, fused into one kernel.
    return fused_replication_pad1d(x, PAD_LEFT, PAD_RIGHT)


def reference_forward(x):
    # Pure-JAX reference: the original three sequential edge pads.
    x = jnp.pad(x, ((0, 0), (0, 0), (2, 2)), mode="edge")
    x = jnp.pad(x, ((0, 0), (0, 0), (3, 4)), mode="edge")
    x = jnp.pad(x, ((0, 0), (0, 0), (1, 0)), mode="edge")
    return x


if __name__ == "__main__":
    key = jax.random.PRNGKey(0)
    # Small shape consistent with the module: (N, C, W)
    x = jax.random.normal(key, (2, 4, 16), dtype=jnp.float32)

    out = model_forward(x)
    out = jax.block_until_ready(out)

    ref = reference_forward(x)
    assert out.shape == (2, 4, 16 + PAD_LEFT + PAD_RIGHT), out.shape
    assert jnp.allclose(out, ref), "mismatch vs reference"
    print("KERNEL_OK")
</pallas_src>

<mosaic_0001>
module attributes {stable_mosaic.version = 11 : i64} {
  func.func @pad_kernel(%arg0: i32, %arg1: memref<8x16xf32, #tpu.memory_space<vmem>>, %arg2: memref<8x28xf32, #tpu.memory_space<vmem>>) attributes {dimension_semantics = [#tpu.dimension_semantics<parallel>], iteration_bounds = array<i64: 1>, scalar_prefetch = 0 : i64, scratch_operands = 0 : i64, tpu.core_type = #tpu.core_type<tc>, window_params = [{transform_indices = @transform_0, window_bounds = array<i64: 8, 16>}, {transform_indices = @transform_1, window_bounds = array<i64: 8, 28>}]} {
    %c0 = arith.constant 0 : index
    %c0_0 = arith.constant 0 : index
    %0 = vector.load %arg1[%c0, %c0_0] : memref<8x16xf32, #tpu.memory_space<vmem>>, vector<8x16xf32>
    %c0_1 = arith.constant 0 : index
    %c6 = arith.constant 6 : index
    %1 = vector.load %arg2[%c0_1, %c6] : memref<8x28xf32, #tpu.memory_space<vmem>>, vector<8x16xf32>
    tpu.vector_store %arg2[%c0_1, %c6], %0 {strides = array<i32>} : memref<8x28xf32, #tpu.memory_space<vmem>>, vector<8x16xf32>,
    %2 = vector.extract_strided_slice %0 {offsets = [0, 0], sizes = [8, 1], strides = [1, 1]} : vector<8x16xf32> to vector<8x1xf32>
    %3 = vector.shape_cast %2 : vector<8x1xf32> to vector<8x1xf32>
    %4 = vector.broadcast %3 : vector<8x1xf32> to vector<8x6xf32>
    %c0_2 = arith.constant 0 : index
    %c0_3 = arith.constant 0 : index
    %5 = vector.load %arg2[%c0_2, %c0_3] : memref<8x28xf32, #tpu.memory_space<vmem>>, vector<8x6xf32>
    tpu.vector_store %arg2[%c0_2, %c0_3], %4 {strides = array<i32>} : memref<8x28xf32, #tpu.memory_space<vmem>>, vector<8x6xf32>,
    %6 = vector.extract_strided_slice %0 {offsets = [0, 15], sizes = [8, 1], strides = [1, 1]} : vector<8x16xf32> to vector<8x1xf32>
    %7 = vector.shape_cast %6 : vector<8x1xf32> to vector<8x1xf32>
    %8 = vector.broadcast %7 : vector<8x1xf32> to vector<8x6xf32>
    %c0_4 = arith.constant 0 : index
    %c22 = arith.constant 22 : index
    %9 = vector.load %arg2[%c0_4, %c22] : memref<8x28xf32, #tpu.memory_space<vmem>>, vector<8x6xf32>
    tpu.vector_store %arg2[%c0_4, %c22], %8 {strides = array<i32>} : memref<8x28xf32, #tpu.memory_space<vmem>>, vector<8x6xf32>,
    return
  }
  func.func @transform_0(%arg0: i32) -> (i32, i32) {
    %c0_i32 = arith.constant 0 : i32
    %c0_i32_0 = arith.constant 0 : i32
    return %arg0, %c0_i32 : i32, i32
  }
  func.func @transform_1(%arg0: i32) -> (i32, i32) {
    %c0_i32 = arith.constant 0 : i32
    %c0_i32_0 = arith.constant 0 : i32
    return %arg0, %c0_i32 : i32, i32
  }
}

</mosaic_0001>

<bundles_post_ra>
// kernel: tpu_custom_call.1
= control target key start
LH: loop header
LB: loop body
LE: loop exit
PB: predicated region body
PF: predicated region fallthrough
CT: control target
= control target key end

     0   :  { %6 = vsyncpa [#allocation3], 0  ;;  %s149_s0 = inlined_call_operand.hbm [shape: f32[8,16], index: 0, kind: input, shape index: {}]   ;;  %s150_s1 = inlined_call_operand.hbm [shape: f32[8,28], index: 1, kind: output, shape index: {}]  }
   0x1   :  { %7 = vsyncpa [#allocation4], 0  ;;  %s110_s6 = smov [#allocation2]   ;;  %s62_s10 = scalar_lea.hbm %s149_s0, 128 }
   0x2   :  { %s14_s7 = sshll.u32 %s110_s6, 4  ;;  %p63_p0 = scmp.ne.s32.totalorder %s149_s0, %s62_s10  ;;  %s15_s7 = int_to_ptr.vmem [resolvable:$true] %s14_s7 }
   0x3   :  { %p66_p1 = scmp.lt.u32.totalorder %s62_s10, %s149_s0 }
   0x5   :  { %p68_p2 = pnand %p66_p1, %p63_p0 }
   0x7   :  { %71 = shalt.err (!%p68_p2)
}
   0x8   :  { %s72_s15 = scalar_lea.vmem %s15_s7, 128  ;;  %p77_p4 = scmp.lt.s32.totalorder %s15_s7, %s15_s7 }
   0x9   :  { %p73_p3 = scmp.ne.s32.totalorder %s15_s7, %s72_s15  ;;  %p78_p5 = scmp.lt.s32.totalorder %s72_s15, %s72_s15 }
   0xb   :  { %p79_p6 = por %p78_p5, %p77_p4 }
   0xd   :  { %p80_p7 = pnand %p79_p6, %p73_p3 }
   0xf   :  { %83 = shalt.err (!%p80_p7)
}
  0x10   :  { %17 = dma.hbm_to_vmem [thread:$0]  %s149_s0, 128, %s15_s7, [#allocation3]  }
  0x11   :  { %106 = dma.done.wait [#allocation3], 128  }
  0x12   :  { %107 = vsyncadd [#allocation3], 4294967168  ;;  %v111_v0 = vmov 0   ;;  %v21_v1 = vld [vmem:[#allocation2] sm:$0xff]  ;;  %s112_s18 = smov 6   ;;  %v113_v2 = vmov 15  }
  0x13   :  { %60 = vset.pattern.permute.xlu0 %v111_v0  ;;  %23 = vrot.lane.b32.xlu1 %v21_v1, %s112_s18  ;;  %vm26_vm0 = vcmask 179248   ;;  %vm32_vm1 = vcmask 48128   ;;  %s114_s19 = smov [#allocation5]   ;;  %vm38_vm2 = vcmask 228528  }
  0x14   :  { %29 = vperm.xlu0 %60, %v21_v1   ;;  %s46_s20 = sshll.u32 %s114_s19, 4  ;;  %s47_s20 = int_to_ptr.vmem [resolvable:$true] %s46_s20 }
  0x15   :  { %s84_s0 = scalar_lea.vmem %s47_s20, 128  ;;  %p89_p9 = scmp.lt.s32.totalorder %s47_s20, %s47_s20 }
  0x16   :  { %p85_p8 = scmp.ne.s32.totalorder %s47_s20, %s84_s0  ;;  %p90_p10 = scmp.lt.s32.totalorder %s84_s0, %s84_s0 }
  0x18   :  { %61 = vset.pattern.permute.xlu0 %v113_v2  ;;  %p91_p11 = por %p90_p10, %p89_p9 }
  0x19   :  { %35 = vperm.xlu0 %61, %v21_v1  }
  0x1a   :  { %p92_p12 = pnand %p91_p11, %p85_p8 }
  0x85   :  { %v24_v3 = vpop.permute.xlu1 %23 }
  0x86   :  { %27 = vst.msk [vmem:[#allocation5] sm:$0xff] %vm26_vm0, %v24_v3 }
  0x93   :  { %v30_v4 = vpop.permute.xlu0 %29 }
  0x94   :  { %33 = vst.msk [vmem:[#allocation5] sm:$0xff] %vm32_vm1, %v30_v4 }
  0x98   :  { %v36_v5 = vpop.permute.xlu0 %35 }
  0x99   :  { %39 = vst.msk [vmem:[#allocation5] sm:$0xff] %vm38_vm2, %v36_v5 }
  0x9a   :  { %95 = shalt.err (!%p92_p12)
}
  0x9b   :  { %s96_s23 = scalar_lea.hbm %s150_s1, 128 }
  0x9c   :  { %p97_p13 = scmp.ne.s32.totalorder %s150_s1, %s96_s23  ;;  %p100_p0 = scmp.lt.u32.totalorder %s96_s23, %s150_s1 }
  0x9e   :  { %p102_p1 = pnand %p100_p0, %p97_p13 }
  0xa0   :  { %105 = shalt.err (!%p102_p1)
}
  0xa1   :  { %49 = dma.vmem_to_hbm [thread:$0]  %s47_s20, 128, %s150_s1, [#allocation4]  }
  0xa2   :  { %108 = dma.done.wait [#allocation4], 128  }
  0xa3   :  { %109 = vsyncadd [#allocation4], 4294967168 }
  0xa4   :  { %53 = vsyncpa [#allocation3], 1 }
  0xa5   :  { %54 = vsyncpa [#allocation4], 1 }

</bundles_post_ra>
